<compile_context>
chip_gen: v6e
topology: v6e:2x2x1
jax: 0.10.0
libtpu: 0.0.40
codegen_flags: <defaults>
</compile_context>

<pallas_src>
import functools

import jax
import jax.numpy as jnp
from jax.experimental import pallas as pl
from jax.experimental.pallas import tpu as pltpu

_NEG_INIT = float(jnp.finfo(jnp.float32).min)


def stn3d_conv_pool_kernel(x_ref, w1_ref, t1_ref, w2_ref, t2_ref, w3_ref,
                           pooled_ref, *, ck):
    """One (batch, point-tile) grid step.

    conv1/conv2 with folded BN + ReLU, then conv3 WITHOUT bias/ReLU (hoisted
    past the max-pool), chunked over output channels, with a running max into
    the resident pooled accumulator block.
    """
    nk = pl.program_id(1)

    x = x_ref[0]  # (tile_n, c_pad) bf16

    # conv1 (1x1) + folded BN1 + ReLU -> (tile_n, 128); cols 64..127 are zero.
    h1 = jnp.maximum(
        jnp.dot(x, w1_ref[...], preferred_element_type=jnp.float32)
        + t1_ref[...], 0.0)
    # conv2 (1x1) + folded BN2 + ReLU -> (tile_n, 128)
    h2 = jnp.maximum(
        jnp.dot(h1.astype(jnp.bfloat16), w2_ref[...],
                preferred_element_type=jnp.float32) + t2_ref[...], 0.0)
    h2b = h2.astype(jnp.bfloat16)

    # Running-max accumulator: init to a large negative (pre-activation conv3
    # outputs can be negative now that ReLU is hoisted).
    @pl.when(nk == 0)
    def _():
        pooled_ref[...] = jnp.full(pooled_ref.shape, _NEG_INIT,
                                   dtype=pooled_ref.dtype)

    # conv3 (1x1), chunked over the 1024 output channels so the live f32
    # intermediate is only (tile_n, ck).  No mask needed: padded tail points
    # are edge-replicated copies of a real point (max unchanged).
    n_out = w3_ref.shape[1]
    for c0 in range(0, n_out, ck):
        s3 = jnp.dot(h2b, w3_ref[:, c0:c0 + ck],
                     preferred_element_type=jnp.float32)      # (tile_n, ck)
        tile_max = jnp.max(s3, axis=0)[None, None, :]          # (1, 1, ck)
        pooled_ref[:, :, c0:c0 + ck] = jnp.maximum(
            pooled_ref[:, :, c0:c0 + ck], tile_max)


def stn3d_head_kernel(g_ref, t3_ref, w4_ref, t4_ref, w5_ref, t5_ref,
                      w6_ref, b6_ref, out_ref):
    """Hoisted relu(pooled + t3) followed by fc1/fc2/fc3, batched over B rows."""
    # Apply the hoisted conv3 BN-shift + ReLU once per batch row (f32).
    g = jnp.maximum(g_ref[...] + t3_ref[...], 0.0).astype(jnp.bfloat16)   # (B,1024)
    f1 = jnp.maximum(
        jnp.dot(g, w4_ref[...], preferred_element_type=jnp.float32)
        + t4_ref[...], 0.0)                                               # (B, 512)
    f2 = jnp.maximum(
        jnp.dot(f1.astype(jnp.bfloat16), w5_ref[...],
                preferred_element_type=jnp.float32) + t5_ref[...], 0.0)   # (B, 256)
    out_ref[...] = (
        jnp.dot(f2.astype(jnp.bfloat16), w6_ref[...],
                preferred_element_type=jnp.float32) + b6_ref[...])        # (B, 128)


def stn3d_forward(x_bcn, kp, *, tile_n=None, ck=256):
    """x_bcn: (B, C, N) float32 (PyTorch Conv1d layout).  Returns (B, 3, 3)."""
    B, C, N = x_bcn.shape
    c_pad = kp["w1"].shape[0]
    assert 1024 % ck == 0

    # NCW -> (B, N, C_pad): channels on the lane axis, zero-padded to >= 8.
    x = jnp.transpose(x_bcn, (0, 2, 1))
    x = jnp.pad(x, ((0, 0), (0, 0), (0, c_pad - C)))

    if tile_n is None:
        # 1024 amortizes per-grid-step overhead on v6e/v7x (prefer ~512 on
        # v5e); for small N use the whole 8-aligned point range as one tile.
        tile_n = 1024 if N >= 1024 else max(8, ((N + 7) // 8) * 8)
    n_pad = ((N + tile_n - 1) // tile_n) * tile_n
    if n_pad > N:
        # Edge-replicate the tail (copies of the last real point): the max-pool
        # result is unchanged and no in-kernel masking is needed.
        x = jnp.pad(x, ((0, 0), (0, n_pad - N), (0, 0)), mode="edge")
    x = x.astype(jnp.bfloat16)
    num_n_tiles = n_pad // tile_n

    def const_spec(shape):
        # Constant block index -> DMA'd once, reused across the whole grid.
        return pl.BlockSpec(shape, lambda b, nk: (0, 0))

    conv_params = (kp["w1"], kp["t1"], kp["w2"], kp["t2"], kp["w3"])
    in_specs = [pl.BlockSpec((1, tile_n, c_pad), lambda b, nk: (b, nk, 0))]
    in_specs += [const_spec(p.shape) for p in conv_params]

    pooled = pl.pallas_call(
        functools.partial(stn3d_conv_pool_kernel, ck=ck),
        out_shape=jax.ShapeDtypeStruct((B, 1, 1024), jnp.float32),
        grid_spec=pltpu.PrefetchScalarGridSpec(
            num_scalar_prefetch=0,
            grid=(B, num_n_tiles),
            in_specs=in_specs,
            out_specs=pl.BlockSpec((1, 1, 1024), lambda b, nk: (b, 0, 0)),
        ),
        compiler_params=pltpu.CompilerParams(
            dimension_semantics=("parallel", "arbitrary"),
            # Working set at tile_n=1024, ck=256 is a few MB; 32 MiB is safe on
            # v5e/v6e (128 MiB) and v7x (64 MiB physical).
            vmem_limit_bytes=32 * 1024 * 1024,
        ),
    )(x, *conv_params)

    pooled = pooled.reshape(B, 1024)

    # Batched FC head (single invocation, whole arrays resident in VMEM).
    vmem = pl.BlockSpec(memory_space=pltpu.MemorySpace.VMEM)
    out = pl.pallas_call(
        stn3d_head_kernel,
        out_shape=jax.ShapeDtypeStruct((B, 128), jnp.float32),
        in_specs=[vmem] * 8,
        out_specs=vmem,
    )(pooled, kp["t3"], kp["w4"], kp["t4"], kp["w5"], kp["t5"],
      kp["w6"], kp["b6"])

    return out[:, :9].reshape(B, 3, 3)


def make_params(key, channel):
    """Deterministic synthetic parameters; BN (eval mode) as scale/shift."""
    eps = 1e-5
    dims = [(channel, 64), (64, 128), (128, 1024), (1024, 512), (512, 256)]
    keys = jax.random.split(key, 64)
    ki = iter(range(64))
    params = {}

    def bn_fold(kout, w_bias):
        gamma = 1.0 + 0.1 * jax.random.normal(keys[next(ki)], (kout,), jnp.float32)
        beta = 0.1 * jax.random.normal(keys[next(ki)], (kout,), jnp.float32)
        rmean = 0.1 * jax.random.normal(keys[next(ki)], (kout,), jnp.float32)
        rvar = 0.5 + jnp.abs(jax.random.normal(keys[next(ki)], (kout,), jnp.float32))
        scale = gamma / jnp.sqrt(rvar + eps)
        shift = beta + scale * (w_bias - rmean)
        return scale[None, :], shift[None, :]

    for li, (kin, kout) in enumerate(dims, start=1):
        w = 0.1 * jax.random.normal(keys[next(ki)], (kin, kout), jnp.float32)
        b = 0.1 * jax.random.normal(keys[next(ki)], (kout,), jnp.float32)
        s, t = bn_fold(kout, b)
        params[f"w{li}"] = w
        params[f"s{li}"] = s
        params[f"t{li}"] = t

    # fc3: 256 -> 9, plus the flattened 3x3 identity offset.
    w6 = 0.1 * jax.random.normal(keys[next(ki)], (256, 9), jnp.float32)
    b6 = 0.1 * jax.random.normal(keys[next(ki)], (9,), jnp.float32)
    iden = jnp.array([1, 0, 0, 0, 1, 0, 0, 0, 1], jnp.float32)
    params["w6"] = w6
    params["b6_iden"] = (b6 + iden)[None, :]  # (1, 9)
    return params


def prepare_kernel_params(params, channel):
    """Fold BN scale into weights, cast MXU inputs to bf16, pad lane dims."""
    c_pad = max(8, ((channel + 7) // 8) * 8)
    kp = {}
    # conv1: fold BN1 scale; pad input channels -> c_pad, outputs 64 -> 128.
    w1 = params["w1"] * params["s1"]                                   # (C, 64)
    kp["w1"] = jnp.pad(w1, ((0, c_pad - channel), (0, 128 - 64))).astype(jnp.bfloat16)
    kp["t1"] = jnp.pad(params["t1"], ((0, 0), (0, 128 - 64)))          # (1, 128)
    # conv2: fold BN2 scale; pad input rows 64 -> 128 (zeros match h1's zero cols).
    w2 = params["w2"] * params["s2"]                                   # (64, 128)
    kp["w2"] = jnp.pad(w2, ((0, 128 - 64), (0, 0))).astype(jnp.bfloat16)
    kp["t2"] = params["t2"]
    # conv3 / fc1 / fc2: fold BN scale column-wise.
    for i in (3, 4, 5):
        kp[f"w{i}"] = (params[f"w{i}"] * params[f"s{i}"]).astype(jnp.bfloat16)
        kp[f"t{i}"] = params[f"t{i}"]
    # fc3: pad the 9-wide output to a lane-dense 128 (zeros beyond column 9).
    kp["w6"] = jnp.pad(params["w6"], ((0, 0), (0, 128 - 9))).astype(jnp.bfloat16)
    kp["b6"] = jnp.pad(params["b6_iden"], ((0, 0), (0, 128 - 9)))
    return kp


def stn3d_reference(x_bcn, kp):
    """Plain-JAX reference using the same folded bf16 weights / f32 accumulation."""
    B, C, N = x_bcn.shape
    c_pad = kp["w1"].shape[0]
    x = jnp.transpose(x_bcn, (0, 2, 1))
    x = jnp.pad(x, ((0, 0), (0, 0), (0, c_pad - C)))

    def mm(a, w):
        return jnp.dot(a.astype(jnp.bfloat16), w, preferred_element_type=jnp.float32)

    h = jax.nn.relu(mm(x, kp["w1"]) + kp["t1"])
    h = jax.nn.relu(mm(h, kp["w2"]) + kp["t2"])
    h = jax.nn.relu(mm(h, kp["w3"]) + kp["t3"])
    g = jnp.max(h, axis=1)                      # (B, 1024)
    f = jax.nn.relu(mm(g, kp["w4"]) + kp["t4"])
    f = jax.nn.relu(mm(f, kp["w5"]) + kp["t5"])
    out = mm(f, kp["w6"]) + kp["b6"]
    return out[:, :9].reshape(B, 3, 3)


if __name__ == "__main__":
    B, C, N = 2, 4, 16  # small test shapes: batch=2, channel=4, points=16
    key = jax.random.PRNGKey(0)
    kx, kparams = jax.random.split(key)
    x = jax.random.normal(kx, (B, C, N), jnp.float32)  # PyTorch NCW input

    params = make_params(kparams, C)
    kp = prepare_kernel_params(params, C)

    out = stn3d_forward(x, kp)
    out = jax.block_until_ready(out)

    ref = stn3d_reference(x, kp)
    assert out.shape == (B, 3, 3)
    assert jnp.allclose(out, ref, atol=5e-3, rtol=5e-3), "mismatch vs reference"

    print("KERNEL_OK")
</pallas_src>

<mosaic_0001>
module attributes {stable_mosaic.version = 11 : i64} {
  func.func @stn3d_conv_pool_kernel(%arg0: i32, %arg1: i32, %arg2: memref<1x16x8xbf16, #tpu.memory_space<vmem>>, %arg3: memref<8x128xbf16, #tpu.memory_space<vmem>>, %arg4: memref<1x128xf32, #tpu.memory_space<vmem>>, %arg5: memref<128x128xbf16, #tpu.memory_space<vmem>>, %arg6: memref<1x128xf32, #tpu.memory_space<vmem>>, %arg7: memref<128x1024xbf16, #tpu.memory_space<vmem>>, %arg8: memref<1x1x1024xf32, #tpu.memory_space<vmem>>) attributes {dimension_semantics = [#tpu.dimension_semantics<parallel>, #tpu.dimension_semantics<arbitrary>], iteration_bounds = array<i64: 2, 1>, scalar_prefetch = 0 : i64, scratch_operands = 0 : i64, tpu.core_type = #tpu.core_type<tc>, window_params = [{transform_indices = @transform_0, window_bounds = array<i64: 1, 16, 8>}, {pipeline_mode = #tpu.pipeline_mode<synchronous>, transform_indices = @transform_1, window_bounds = array<i64: 8, 128>}, {pipeline_mode = #tpu.pipeline_mode<synchronous>, transform_indices = @transform_2, window_bounds = array<i64: 1, 128>}, {pipeline_mode = #tpu.pipeline_mode<synchronous>, transform_indices = @transform_3, window_bounds = array<i64: 128, 128>}, {pipeline_mode = #tpu.pipeline_mode<synchronous>, transform_indices = @transform_4, window_bounds = array<i64: 1, 128>}, {pipeline_mode = #tpu.pipeline_mode<synchronous>, transform_indices = @transform_5, window_bounds = array<i64: 128, 1024>}, {transform_indices = @transform_6, window_bounds = array<i64: 1, 1, 1024>}]} {
    %c0 = arith.constant 0 : index
    %c0_0 = arith.constant 0 : index
    %c0_1 = arith.constant 0 : index
    %0 = vector.load %arg2[%c0, %c0_0, %c0_1] : memref<1x16x8xbf16, #tpu.memory_space<vmem>>, vector<1x16x8xbf16>
    %1 = vector.shape_cast %0 : vector<1x16x8xbf16> to vector<16x8xbf16>
    %c0_2 = arith.constant 0 : index
    %c0_3 = arith.constant 0 : index
    %2 = vector.load %arg3[%c0_2, %c0_3] : memref<8x128xbf16, #tpu.memory_space<vmem>>, vector<8x128xbf16>
    %cst = arith.constant dense<0.000000e+00> : vector<16x128xf32>
    %3 = tpu.matmul %1, %2, %cst {dimension_numbers = #tpu.dot_dimension_numbers<[1], [0], [0], [1], [0, 0, 1, 1], [], []>} : vector<16x8xbf16>, vector<8x128xbf16>, vector<16x128xf32> -> vector<16x128xf32>
    %c0_4 = arith.constant 0 : index
    %c0_5 = arith.constant 0 : index
    %4 = vector.load %arg4[%c0_4, %c0_5] : memref<1x128xf32, #tpu.memory_space<vmem>>, vector<1x128xf32>
    %5 = vector.broadcast %4 : vector<1x128xf32> to vector<16x128xf32>
    %6 = arith.addf %3, %5 : vector<16x128xf32>
    %cst_6 = arith.constant 0.000000e+00 : f32
    %7 = vector.broadcast %cst_6 : f32 to vector<16x128xf32>
    %8 = arith.maximumf %6, %7 : vector<16x128xf32>
    %9 = arith.truncf %8 : vector<16x128xf32> to vector<16x128xbf16>
    %c0_7 = arith.constant 0 : index
    %c0_8 = arith.constant 0 : index
    %10 = vector.load %arg5[%c0_7, %c0_8] : memref<128x128xbf16, #tpu.memory_space<vmem>>, vector<128x128xbf16>
    %cst_9 = arith.constant dense<0.000000e+00> : vector<16x128xf32>
    %11 = tpu.matmul %9, %10, %cst_9 {dimension_numbers = #tpu.dot_dimension_numbers<[1], [0], [0], [1], [0, 0, 1, 1], [], []>} : vector<16x128xbf16>, vector<128x128xbf16>, vector<16x128xf32> -> vector<16x128xf32>
    %c0_10 = arith.constant 0 : index
    %c0_11 = arith.constant 0 : index
    %12 = vector.load %arg6[%c0_10, %c0_11] : memref<1x128xf32, #tpu.memory_space<vmem>>, vector<1x128xf32>
    %13 = vector.broadcast %12 : vector<1x128xf32> to vector<16x128xf32>
    %14 = arith.addf %11, %13 : vector<16x128xf32>
    %cst_12 = arith.constant 0.000000e+00 : f32
    %15 = vector.broadcast %cst_12 : f32 to vector<16x128xf32>
    %16 = arith.maximumf %14, %15 : vector<16x128xf32>
    %17 = arith.truncf %16 : vector<16x128xf32> to vector<16x128xbf16>
    %c0_i32 = arith.constant 0 : i32
    %18 = arith.cmpi eq, %arg1, %c0_i32 : i32
    %19 = arith.extui %18 : i1 to i32
    %c0_i32_13 = arith.constant 0 : i32
    %20 = arith.cmpi ne, %19, %c0_i32_13 : i32
    scf.if %20 {
      %cst_51 = arith.constant -3.40282347E+38 : f32
      %49 = vector.broadcast %cst_51 : f32 to vector<1x1x1024xf32>
      %c0_52 = arith.constant 0 : index
      %c0_53 = arith.constant 0 : index
      %c0_54 = arith.constant 0 : index
      %50 = vector.load %arg8[%c0_52, %c0_53, %c0_54] : memref<1x1x1024xf32, #tpu.memory_space<vmem>>, vector<1x1x1024xf32>
      tpu.vector_store %arg8[%c0_52, %c0_53, %c0_54], %49 {strides = array<i32>} : memref<1x1x1024xf32, #tpu.memory_space<vmem>>, vector<1x1x1024xf32>,
    } else {
    }
    %c0_14 = arith.constant 0 : index
    %c0_15 = arith.constant 0 : index
    %21 = vector.load %arg7[%c0_14, %c0_15] : memref<128x1024xbf16, #tpu.memory_space<vmem>>, vector<128x256xbf16>
    %cst_16 = arith.constant dense<0.000000e+00> : vector<16x256xf32>
    %22 = tpu.matmul %17, %21, %cst_16 {dimension_numbers = #tpu.dot_dimension_numbers<[1], [0], [0], [1], [0, 0, 1, 1], [], []>} : vector<16x128xbf16>, vector<128x256xbf16>, vector<16x256xf32> -> vector<16x256xf32>
    %cst_17 = arith.constant dense<0xFF800000> : vector<256xf32>
    %23 = vector.multi_reduction <maximumf>, %22, %cst_17 [0] : vector<16x256xf32> to vector<256xf32>
    %24 = vector.shape_cast %23 : vector<256xf32> to vector<1x1x256xf32>
    %c0_18 = arith.constant 0 : index
    %c0_19 = arith.constant 0 : index
    %c0_20 = arith.constant 0 : index
    %25 = vector.load %arg8[%c0_18, %c0_19, %c0_20] : memref<1x1x1024xf32, #tpu.memory_space<vmem>>, vector<1x1x256xf32>
    %26 = arith.maximumf %25, %24 : vector<1x1x256xf32>
    %c0_21 = arith.constant 0 : index
    %c0_22 = arith.constant 0 : index
    %c0_23 = arith.constant 0 : index
    %27 = vector.load %arg8[%c0_21, %c0_22, %c0_23] : memref<1x1x1024xf32, #tpu.memory_space<vmem>>, vector<1x1x256xf32>
    tpu.vector_store %arg8[%c0_21, %c0_22, %c0_23], %26 {strides = array<i32>} : memref<1x1x1024xf32, #tpu.memory_space<vmem>>, vector<1x1x256xf32>,
    %c0_24 = arith.constant 0 : index
    %c256 = arith.constant 256 : index
    %28 = vector.load %arg7[%c0_24, %c256] : memref<128x1024xbf16, #tpu.memory_space<vmem>>, vector<128x256xbf16>
    %cst_25 = arith.constant dense<0.000000e+00> : vector<16x256xf32>
    %29 = tpu.matmul %17, %28, %cst_25 {dimension_numbers = #tpu.dot_dimension_numbers<[1], [0], [0], [1], [0, 0, 1, 1], [], []>} : vector<16x128xbf16>, vector<128x256xbf16>, vector<16x256xf32> -> vector<16x256xf32>
    %cst_26 = arith.constant dense<0xFF800000> : vector<256xf32>
    %30 = vector.multi_reduction <maximumf>, %29, %cst_26 [0] : vector<16x256xf32> to vector<256xf32>
    %31 = vector.shape_cast %30 : vector<256xf32> to vector<1x1x256xf32>
    %c0_27 = arith.constant 0 : index
    %c0_28 = arith.constant 0 : index
    %c256_29 = arith.constant 256 : index
    %32 = vector.load %arg8[%c0_27, %c0_28, %c256_29] : memref<1x1x1024xf32, #tpu.memory_space<vmem>>, vector<1x1x256xf32>
    %33 = arith.maximumf %32, %31 : vector<1x1x256xf32>
    %c0_30 = arith.constant 0 : index
    %c0_31 = arith.constant 0 : index
    %c256_32 = arith.constant 256 : index
    %34 = vector.load %arg8[%c0_30, %c0_31, %c256_32] : memref<1x1x1024xf32, #tpu.memory_space<vmem>>, vector<1x1x256xf32>
    tpu.vector_store %arg8[%c0_30, %c0_31, %c256_32], %33 {strides = array<i32>} : memref<1x1x1024xf32, #tpu.memory_space<vmem>>, vector<1x1x256xf32>,
    %c0_33 = arith.constant 0 : index
    %c512 = arith.constant 512 : index
    %35 = vector.load %arg7[%c0_33, %c512] : memref<128x1024xbf16, #tpu.memory_space<vmem>>, vector<128x256xbf16>
    %cst_34 = arith.constant dense<0.000000e+00> : vector<16x256xf32>
    %36 = tpu.matmul %17, %35, %cst_34 {dimension_numbers = #tpu.dot_dimension_numbers<[1], [0], [0], [1], [0, 0, 1, 1], [], []>} : vector<16x128xbf16>, vector<128x256xbf16>, vector<16x256xf32> -> vector<16x256xf32>
    %cst_35 = arith.constant dense<0xFF800000> : vector<256xf32>
    %37 = vector.multi_reduction <maximumf>, %36, %cst_35 [0] : vector<16x256xf32> to vector<256xf32>
    %38 = vector.shape_cast %37 : vector<256xf32> to vector<1x1x256xf32>
    %c0_36 = arith.constant 0 : index
    %c0_37 = arith.constant 0 : index
    %c512_38 = arith.constant 512 : index
    %39 = vector.load %arg8[%c0_36, %c0_37, %c512_38] : memref<1x1x1024xf32, #tpu.memory_space<vmem>>, vector<1x1x256xf32>
    %40 = arith.maximumf %39, %38 : vector<1x1x256xf32>
    %c0_39 = arith.constant 0 : index
    %c0_40 = arith.constant 0 : index
    %c512_41 = arith.constant 512 : index
    %41 = vector.load %arg8[%c0_39, %c0_40, %c512_41] : memref<1x1x1024xf32, #tpu.memory_space<vmem>>, vector<1x1x256xf32>
    tpu.vector_store %arg8[%c0_39, %c0_40, %c512_41], %40 {strides = array<i32>} : memref<1x1x1024xf32, #tpu.memory_space<vmem>>, vector<1x1x256xf32>,
    %c0_42 = arith.constant 0 : index
    %c768 = arith.constant 768 : index
    %42 = vector.load %arg7[%c0_42, %c768] : memref<128x1024xbf16, #tpu.memory_space<vmem>>, vector<128x256xbf16>
    %cst_43 = arith.constant dense<0.000000e+00> : vector<16x256xf32>
    %43 = tpu.matmul %17, %42, %cst_43 {dimension_numbers = #tpu.dot_dimension_numbers<[1], [0], [0], [1], [0, 0, 1, 1], [], []>} : vector<16x128xbf16>, vector<128x256xbf16>, vector<16x256xf32> -> vector<16x256xf32>
    %cst_44 = arith.constant dense<0xFF800000> : vector<256xf32>
    %44 = vector.multi_reduction <maximumf>, %43, %cst_44 [0] : vector<16x256xf32> to vector<256xf32>
    %45 = vector.shape_cast %44 : vector<256xf32> to vector<1x1x256xf32>
    %c0_45 = arith.constant 0 : index
    %c0_46 = arith.constant 0 : index
    %c768_47 = arith.constant 768 : index
    %46 = vector.load %arg8[%c0_45, %c0_46, %c768_47] : memref<1x1x1024xf32, #tpu.memory_space<vmem>>, vector<1x1x256xf32>
    %47 = arith.maximumf %46, %45 : vector<1x1x256xf32>
    %c0_48 = arith.constant 0 : index
    %c0_49 = arith.constant 0 : index
    %c768_50 = arith.constant 768 : index
    %48 = vector.load %arg8[%c0_48, %c0_49, %c768_50] : memref<1x1x1024xf32, #tpu.memory_space<vmem>>, vector<1x1x256xf32>
    tpu.vector_store %arg8[%c0_48, %c0_49, %c768_50], %47 {strides = array<i32>} : memref<1x1x1024xf32, #tpu.memory_space<vmem>>, vector<1x1x256xf32>,
    return
  }
  func.func @transform_0(%arg0: i32, %arg1: i32) -> (i32, i32, i32) {
    %c0_i32 = arith.constant 0 : i32
    %c0_i32_0 = arith.constant 0 : i32
    return %arg0, %arg1, %c0_i32 : i32, i32, i32
  }
  func.func @transform_1(%arg0: i32, %arg1: i32) -> (i32, i32) {
    %c0_i32 = arith.constant 0 : i32
    %c0_i32_0 = arith.constant 0 : i32
    %c0_i32_1 = arith.constant 0 : i32
    return %c0_i32, %c0_i32_0 : i32, i32
  }
  func.func @transform_2(%arg0: i32, %arg1: i32) -> (i32, i32) {
    %c0_i32 = arith.constant 0 : i32
    %c0_i32_0 = arith.constant 0 : i32
    %c0_i32_1 = arith.constant 0 : i32
    return %c0_i32, %c0_i32_0 : i32, i32
  }
  func.func @transform_3(%arg0: i32, %arg1: i32) -> (i32, i32) {
    %c0_i32 = arith.constant 0 : i32
    %c0_i32_0 = arith.constant 0 : i32
    %c0_i32_1 = arith.constant 0 : i32
    return %c0_i32, %c0_i32_0 : i32, i32
  }
  func.func @transform_4(%arg0: i32, %arg1: i32) -> (i32, i32) {
    %c0_i32 = arith.constant 0 : i32
    %c0_i32_0 = arith.constant 0 : i32
    %c0_i32_1 = arith.constant 0 : i32
    return %c0_i32, %c0_i32_0 : i32, i32
  }
  func.func @transform_5(%arg0: i32, %arg1: i32) -> (i32, i32) {
    %c0_i32 = arith.constant 0 : i32
    %c0_i32_0 = arith.constant 0 : i32
    %c0_i32_1 = arith.constant 0 : i32
    return %c0_i32, %c0_i32_0 : i32, i32
  }
  func.func @transform_6(%arg0: i32, %arg1: i32) -> (i32, i32, i32) {
    %c0_i32 = arith.constant 0 : i32
    %c0_i32_0 = arith.constant 0 : i32
    %c0_i32_1 = arith.constant 0 : i32
    return %arg0, %c0_i32, %c0_i32_0 : i32, i32, i32
  }
}

</mosaic_0001>

<bundles_post_ra>
// kernel: tpu_custom_call.1
= control target key start
LH: loop header
LB: loop body
LE: loop exit
PB: predicated region body
PF: predicated region fallthrough
CT: control target
= control target key end

     0   :  { %11 = vsyncpa [#allocation3], 0  ;;  %s1919_s0 = inlined_call_operand.vmem [shape: bf16[2,16,8], index: 0, kind: input, shape index: {}]   ;;  %s1920_s1 = inlined_call_operand.vmem [shape: bf16[8,128], index: 1, kind: input, shape index: {}]   ;;  %s1921_s2 = inlined_call_operand.vmem [shape: f32[1,128], index: 2, kind: input, shape index: {}]   ;;  %s1922_s3 = inlined_call_operand.hbm [shape: bf16[128,128], index: 3, kind: input, shape index: {}]   ;;  %s1923_s4 = inlined_call_operand.vmem [shape: f32[1,128], index: 4, kind: input, shape index: {}]   ;;  %s1924_s5 = inlined_call_operand.hbm [shape: bf16[128,1024], index: 5, kind: input, shape index: {}]   ;;  %s1925_s6 = inlined_call_operand.hbm [shape: f32[2,1,1024], index: 6, kind: output, shape index: {}]  }
   0x1   :  { %12 = vsyncpa [#allocation6], 0 }
   0x2   :  { %13 = vsyncpa [#allocation4], 0 }
   0x3   :  { %15 = vsyncpa [#allocation4 + $0x1], 0  ;;  %s1717_s21 = smov 0   ;;  %s1719_s22 = smov 0  }
   0x4   :  { %s1721_s23 = smov 0   ;;  %s1723_s24 = smov 0  }
   0x5   :  { %s1725_s25 = smov 0   ;;  %s1727_s26 = smov 0  }
   0x6 LB: > { %s1306_s27 = sadd.s32 4294967295, %s1668_s26   ;;  %s1307_s28 = sadd.s32 4294967294, %s1668_s26   ;;  %s1668_s26 = sphi %s1727_s26, %s21_s26   ;;  %s1664_s25 = sphi %s1725_s25, %s1940_s25   ;;  %s1660_s24 = sphi %s1723_s24, %s1939_s24   ;;  %s1656_s23 = sphi %s1721_s23, %s1938_s23   ;;  %s1652_s22 = sphi %s1719_s22, %s1937_s22   ;;  %s1648_s21 = sphi %s1717_s21, %s1936_s21  }
   0x7   : > { %s33_s29 = sadd.s32 1, %s1664_s25  ;;  %s173_s30 = sadd.s32 1, %s1656_s23 }
   0x8   : > { %p35_p0 = scmp.ge.s32.totalorder %s33_s29, 2  ;;  %p183_p1 = scmp.ne.s32.totalorder %s1656_s23, %s1652_s22 }
   0x9   : > { %p184_p2 = scmp.eq.s32.totalorder %s1306_s27, 1  ;;  %p189_p3 = scmp.ne.s32.totalorder %s1652_s22, %s1648_s21 }
   0xa   : > { %s1942_s29 = smov (%p35_p0, %s33_s29), 0  ;;  %p190_p5 = scmp.eq.s32.totalorder %s1307_s28, 1 }
   0xb   : > { %p1757_p4 = por %p184_p2, %p183_p1  ;;  %s170_s8 = ssub.s32 %s1664_s25, %s1942_s29 }
   0xc   : > { %p1308_p6 = scmp.ge.s32.totalorder %s1668_s26, 1  ;;  %p171_p7 = scmp.eq.s32.totalorder %s170_s8, 0 }
   0xd   : > { %s1927_s7 = scalar_select %p1757_p4, 1, 0 }
   0xe   : > { %p1764_p8 = por %p190_p5, %p189_p3  ;;  %p197_p9 = scmp.lt.s32.totalorder %s1668_s26, 3 }
   0xf   : > { %s1770_s10 = scalar_select %p171_p7, %s1656_s23, %s173_s30  }
  0x10   : > { %s1928_s9 = scalar_select %p1764_p8, 1, 0 }
  0x11   : > { %p1772_p10 = pnand %p1308_p6, %p197_p9  ;;  %p1776_p11 = scmp.eq.s32.totalorder %s1306_s27, 0 }
  0x12   : > { %s1670_s13 = smov [#allocation2]   ;;  %s1671_s16 = smov [#allocation5]  }
  0x13   : > { %p1448_p12 = pneg %p1772_p10  ;;  %s215_s14 = sshll.u32 %s1670_s13, 4  ;;  %s216_s14 = int_to_ptr.vmem [resolvable:$true] %s215_s14 }
  0x14   : > { %s231_s17 = sshll.u32 %s1671_s16, 4  ;;  %s1543_s18 = scalar_lea.vmem %s216_s14, 1024  ;;  %s232_s17 = int_to_ptr.vmem [resolvable:$true] %s231_s17 }
  0x15   : > { %p1784_p13 = pnand %p1776_p11, %p1448_p12  ;;  %p1544_p1 = scmp.ne.s32.totalorder %s216_s14, %s1543_s18 }
  0x16   : > { %p1551_p5 = scmp.lt.s32.totalorder %s216_s14, %s216_s14  ;;  %p1552_p6 = scmp.lt.s32.totalorder %s1543_s18, %s1543_s18 }
  0x17   : > { %p1534_p0 = pneg %p1784_p13 }
  0x18   : > { %p1553_p7 = por %p1552_p6, %p1551_p5 }
  0x19   : > { %p1546_p2 = pnand %p1544_p1, %p1534_p0 }
  0x1b   : > { %p1547_p3 = pneg %p1546_p2 }
  0x1d   : > { %p1554_p9 = pnand %p1553_p7, %p1547_p3 }
  0x1f   : > { %1557 = shalt.err (!%p1554_p9)
}
  0x20   : > { %s1672_s19 = smov 64   ;;  %s1673_s20 = smov 4  }
  0x21   : > { %1451 = dma.hbm_to_vmem [thread:$0]  (!%p1784_p13), %s1922_s3, 1024, %s216_s14, [#allocation3], %s1672_s19, %s1672_s19, %s1673_s20  }
  0x22   : > { %s1569_s30 = scalar_lea.vmem %s232_s17, 8192  ;;  %p1577_p8 = scmp.lt.s32.totalorder %s232_s17, %s232_s17 }
  0x23   : > { %p1570_p12 = scmp.ne.s32.totalorder %s232_s17, %s1569_s30  ;;  %p1578_p4 = scmp.lt.s32.totalorder %s1569_s30, %s1569_s30 }
  0x25   : > { %p1572_p1 = pnand %p1570_p12, %p1534_p0  ;;  %p1579_p5 = por %p1578_p4, %p1577_p8 }
  0x27   : > { %p1573_p2 = pneg %p1572_p1 }
  0x29   : > { %p1580_p3 = pnand %p1579_p5, %p1573_p2 }
  0x2b   : > { %1583 = shalt.err (!%p1580_p3)
}
  0x2c   : > { %s1674_s8 = smov 512   ;;  %s1675_s13 = smov 32  }
  0x2d   : > { %1454 = dma.hbm_to_vmem [thread:$0]  (!%p1784_p13), %s1924_s5, 8192, %s232_s17, [#allocation6], %s1674_s8, %s1674_s8, %s1675_s13  }
  0x2e   : > { %260 = sbr.rel (%p1772_p10) target bundleno = 733 (0x2dd), region = 44 }
  0x33   : > { %1635 = dma.done.wait (%p1776_p11), [#allocation3], 1024  }
  0x34   : > { %1637 = vsyncadd (%p1776_p11), [#allocation3], 4294966272 }
  0x35   : > { %1639 = dma.done.wait (%p1776_p11), [#allocation6], 8192  }
  0x36   : > { %1641 = vsyncadd (%p1776_p11), [#allocation6], 4294959104  ;;  %p299_p4 = scmp.lt.s32.totalorder %s1660_s24, 1  ;;  %v1676_v0 = vmov 0.0   ;;  %vm1677_vm0 = vmmov 0   ;;  %vm328_vm1 = vcmask 1043456  }
  0x37   : > { %1412 = vmatprep.subr.bf16.mxu0 %v1676_v0  ;;  %1414 = vmatprep.mubr.msk.bf16.mxu0 %vm1677_vm0, %v1676_v0  ;;  %v311_v1 = vld [vmem:[%s1920_s1] sm:$0xf]  ;;  %vm324_vm2 = vcmask 64512   ;;  %v1524_v4 = vld [vmem:[#allocation2 + $0x38] sm:$0xff]   ;;  %v1525_v5 = vld [vmem:[#allocation2 + $0x30] sm:$0xff]   ;;  %s295_s13 = sand.u32 1, %s1652_s22  }
  0x38   : > { %s300_s11 = scalar_select %p299_p4, %s1660_s24, 1  ;;  %1418 = vmatprep.subr.bf16.mxu1 %v1676_v0  ;;  %1434 = vmatprep.mubr.msk.bf16.mxu1 %vm1677_vm0, %v1676_v0  ;;  %v330_v2 = vsel %vm328_vm1, %v311_v1, 0  ;;  %v1526_v6 = vld [vmem:[#allocation2 + $0x28] sm:$0xff]   ;;  %v1527_v7 = vld [vmem:[#allocation2 + $0x20] sm:$0xff]   ;;  %v1528_v8 = vld [vmem:[#allocation2 + $0x18] sm:$0xff]  }
  0x39   : > { %1413 = vmatpush3.bf16.msra.mxu0 %v330_v2  ;;  %1419 = vmatpush3.bf16.msra.mxu1 %v1524_v4  ;;  %v1529_v9 = vld [vmem:[#allocation2 + $0x10] sm:$0xff]   ;;  %v1530_v10 = vld [vmem:[#allocation2 + $0x8] sm:$0xff]   ;;  %v1531_v11 = vld [vmem:[#allocation2] sm:$0xff]   ;;  %s1315_s16 = sshll.u32 %s295_s13, 3  ;;  %p1934_p10 = scmp.ne.s32.totalorder %s1927_s7, 0 }
  0x3a   : > { %s1399_s14 = sshll.u32 %s300_s11, 3  ;;  %1420 = vmatprep.subr.bf16.mxu1 %v1676_v0  ;;  %v510_v12 = vld [vmem:[#allocation5 + $0x1c0] sm:$0xff]  ;;  %v688_v14 = vld [vmem:[#allocation5 + $0x1c8] sm:$0xff]  ;;  %s1839_s18 = scalar_lea.vmem [#allocation7], %s1315_s16 }
  0x3b   : > { %s306_s19 = scalar_lea.vmem %s1919_s0, %s1399_s14  ;;  %v511_v13 = vld [vmem:[#allocation5 + $0x1e0] sm:$0xff]  ;;  %v689_v17 = vld [vmem:[#allocation5 + $0x1e8] sm:$0xff]  ;;  %s1400_s11 = sshll.u32 %s1660_s24, 7 }
  0x3c   : > { %v1523_v3 = vld [vmem:[%s306_s19] sm:$0xff]   ;;  %v1344_v15 = vcombine.low %v510_v12, %v511_v13  ;;  %v1345_v16 = vcombine.high %v510_v12, %v511_v13  ;;  %v1360_v20 = vcombine.low %v688_v14, %v689_v17  ;;  %v1361_v21 = vcombine.high %v688_v14, %v689_v17  ;;  %v686_v47 = vld [vmem:[#allocation5 + $0x188] sm:$0xff]  ;;  %s1211_s14 = sshll.u32 %s1839_s18, 4  ;;  %s1871_s19 = scalar_lea.hbm %s1925_s6, %s1400_s11  ;;  %s1212_s14 = int_to_ptr.vmem [resolvable:$true] %s1211_s14 }
  0x3d   : > { %1415 = vmatmul.mubr.msk.bf16.vlgmr.msra.gmra.mxu0 %vm324_vm2, %v1523_v3  ;;  %1421 = vmatpush3.bf16.msra.mxu1 %v1525_v5  ;;  %v508_v18 = vld [vmem:[#allocation5 + $0x180] sm:$0xff]  ;;  %v687_v48 = vld [vmem:[#allocation5 + $0x1a8] sm:$0xff]  ;;  %s1197_s24 = scalar_lea.sflag [#allocation4], %s295_s13  ;;  %s1584_s20 = scalar_lea.vmem %s1212_s14, 128 }
  0x3e   : > { %1422 = vmatprep.subr.bf16.mxu1 %v1676_v0  ;;  %v509_v19 = vld [vmem:[#allocation5 + $0x1a0] sm:$0xff]  ;;  %592 = vmatprep.subr.bf16.mxu0 %v1345_v16  ;;  %v1359_v52 = vcombine.high %v686_v47, %v687_v48  ;;  %v684_v53 = vld [vmem:[#allocation5 + $0x148] sm:$0xff]  ;;  %v1358_v55 = vcombine.low %v686_v47, %v687_v48  ;;  %v858_v47 = vld [vmem:[#allocation5 + $0x150] sm:$0xff]  ;;  %p1585_p8 = scmp.ne.s32.totalorder %s1212_s14, %s1584_s20  ;;  %s1681_s27 = smov [#allocation7]  }
  0x3f   : > { %v1343_v22 = vcombine.high %v508_v18, %v509_v19  ;;  %593 = vmatpush1.bf16.msra.mxu0 %v1344_v15  ;;  %v1342_v23 = vcombine.low %v508_v18, %v509_v19  ;;  %v506_v24 = vld [vmem:[#allocation5 + $0x140] sm:$0xff]  ;;  %v685_v54 = vld [vmem:[#allocation5 + $0x168] sm:$0xff]  ;;  %v859_v48 = vld [vmem:[#allocation5 + $0x170] sm:$0xff]  ;;  %s1588_s12 = sshll.u32 %s1681_s27, 4  ;;  %s1589_s12 = int_to_ptr.vmem [resolvable:$false] %s1588_s12 }
  0x40   : > { %v507_v25 = vld [vmem:[#allocation5 + $0x160] sm:$0xff]  ;;  %v1357_v56 = vcombine.high %v684_v53, %v685_v54  ;;  %v682_v57 = vld [vmem:[#allocation5 + $0x108] sm:$0xff]  ;;  %v1356_v59 = vcombine.low %v684_v53, %v685_v54  ;;  %v1373_v53 = vcombine.high %v858_v47, %v859_v48  ;;  %p1586_p11 = pnand %p1585_p8, %p1934_p10  ;;  %s1590_s28 = scalar_lea.vmem %s1589_s12, 256 }
  0x41   : > { %1423 = vmatpush3.bf16.msra.mxu1 %v1526_v6  ;;  %594 = vmatprep.subr.bf16.mxu0 %v1343_v22  ;;  %v1341_v26 = vcombine.high %v506_v24, %v507_v25  ;;  %v1340_v27 = vcombine.low %v506_v24, %v507_v25  ;;  %v504_v28 = vld [vmem:[#allocation5 + $0x100] sm:$0xff]  ;;  %v683_v58 = vld [vmem:[#allocation5 + $0x128] sm:$0xff]  ;;  %v862_v22 = vld [vmem:[#allocation5 + $0x1d0] sm:$0xff]  ;;  %p1591_p0 = scmp.lt.s32.totalorder %s1212_s14, %s1589_s12  ;;  %p1592_p6 = scmp.lt.s32.totalorder %s1590_s28, %s1584_s20 }
  0x42   : > { %1424 = vmatprep.subr.bf16.mxu1 %v1676_v0  ;;  %v505_v29 = vld [vmem:[#allocation5 + $0x120] sm:$0xff]  ;;  %v1355_v60 = vcombine.high %v682_v57, %v683_v58  ;;  %v680_v61 = vld [vmem:[#allocation5 + $0xc8] sm:$0xff]  ;;  %v1354_v63 = vcombine.low %v682_v57, %v683_v58  ;;  %v1036_v24 = vld [vmem:[#allocation5 + $0x1d8] sm:$0xff]  ;;  %p1587_p13 = pneg %p1586_p11 }
  0x43   : > { %595 = vmatpush1.bf16.msra.mxu0 %v1342_v23  ;;  %v1339_v30 = vcombine.high %v504_v28, %v505_v29  ;;  %v1338_v31 = vcombine.low %v504_v28, %v505_v29  ;;  %v502_v32 = vld [vmem:[#allocation5 + $0xc0] sm:$0xff]  ;;  %v681_v62 = vld [vmem:[#allocation5 + $0xe8] sm:$0xff]  ;;  %v863_v23 = vld [vmem:[#allocation5 + $0x1f0] sm:$0xff]  ;;  %p1593_p7 = por %p1592_p6, %p1591_p0 }
  0x44   : > { %596 = vmatprep.subr.bf16.mxu0 %v1341_v26  ;;  %v503_v33 = vld [vmem:[#allocation5 + $0xe0] sm:$0xff]  ;;  %v678_v1 = vld [vmem:[#allocation5 + $0x88] sm:$0xff]  ;;  %v1352_v3 = vcombine.low %v680_v61, %v681_v62  ;;  %v1377_v25 = vcombine.high %v862_v22, %v863_v23  ;;  %v1037_v26 = vld [vmem:[#allocation5 + $0x1f8] sm:$0xff] }
  0x45   : > { %1425 = vmatpush3.bf16.msra.mxu1 %v1527_v7  ;;  %v1337_v34 = vcombine.high %v502_v32, %v503_v33  ;;  %v1336_v35 = vcombine.low %v502_v32, %v503_v33  ;;  %v500_v36 = vld [vmem:[#allocation5 + $0x80] sm:$0xff]  ;;  %v679_v2 = vld [vmem:[#allocation5 + $0xa8] sm:$0xff]  ;;  %v1392_v28 = vcombine.low %v1036_v24, %v1037_v26  ;;  %v1393_v29 = vcombine.high %v1036_v24, %v1037_v26  ;;  %v1030_v57 = vld [vmem:[#allocation5 + $0x118] sm:$0xff]  ;;  %p1594_p9 = pnand %p1593_p7, %p1587_p13 }
  0x46   : > { %1426 = vmatprep.subr.bf16.mxu1 %v1676_v0  ;;  %v501_v37 = vld [vmem:[#allocation5 + $0xa0] sm:$0xff]  ;;  %v1351_v4 = vcombine.high %v678_v1, %v679_v2  ;;  %v1350_v5 = vcombine.low %v678_v1, %v679_v2  ;;  %v674_v16 = vld [vmem:[#allocation5 + $0x8] sm:$0xff]  ;;  %v1031_v58 = vld [vmem:[#allocation5 + $0x138] sm:$0xff] }
  0x47   : > { %597 = vmatpush1.bf16.msra.mxu0 %v1340_v27  ;;  %v1335_v38 = vcombine.high %v500_v36, %v501_v37  ;;  %v1334_v39 = vcombine.low %v500_v36, %v501_v37  ;;  %v1318_v40 = vld [vmem:[%s1921_s2] ss:$0 sm:$0xff]  ;;  %v675_v18 = vld [vmem:[#allocation5 + $0x28] sm:$0xff]  ;;  %v1376_v27 = vcombine.low %v862_v22, %v863_v23  ;;  %v860_v37 = vld [vmem:[#allocation5 + $0x190] sm:$0xff] }
  0x48   : > { %598 = vmatprep.subr.bf16.mxu0 %v1339_v30  ;;  %v498_v6 = vld [vmem:[#allocation5 + $0x40] sm:$0xff]  ;;  %v1678_v30 = vmov 0   ;;  %v1028_v1 = vld [vmem:[#allocation5 + $0xd8] sm:$0xff]  ;;  %v848_v23 = vld [vmem:[#allocation5 + $0x10] sm:$0xff] }
  0x49   : > { %1427 = vmatpush3.bf16.msra.mxu1 %v1528_v8  ;;  %v499_v7 = vld [vmem:[#allocation5 + $0x60] sm:$0xff]  ;;  %v676_v8 = vld [vmem:[#allocation5 + $0x48] sm:$0xff]  ;;  %624 = vmatprep.mubr.bf16.mxu0 %v1678_v30  ;;  %v1029_v2 = vld [vmem:[#allocation5 + $0xf8] sm:$0xff] }
  0x4a   : > { %1428 = vmatprep.subr.bf16.mxu1 %v1676_v0  ;;  %v496_v14 = vld [vmem:[#allocation5] sm:$0xff]  ;;  %v849_v24 = vld [vmem:[#allocation5 + $0x30] sm:$0xff]  ;;  %v1023_v26 = vld [vmem:[#allocation5 + $0x38] sm:$0xff] }
  0x4b   : > { %599 = vmatpush1.bf16.msra.mxu0 %v1338_v31  ;;  %v497_v15 = vld [vmem:[#allocation5 + $0x20] sm:$0xff] }
  0x4c   : > { %600 = vmatprep.subr.bf16.mxu0 %v1337_v34  ;;  %v1331_v17 = vcombine.high %v496_v14, %v497_v15  ;;  %v1330_v19 = vcombine.low %v496_v14, %v497_v15  ;;  %v1321_v31 = vld [vmem:[%s1923_s4] ss:$0 sm:$0xff]  ;;  %v850_v15 = vld [vmem:[#allocation5 + $0x50] sm:$0xff] }
  0x4d   : > { %1429 = vmatpush3.bf16.msra.mxu1 %v1529_v9  ;;  %v1333_v9 = vcombine.high %v498_v6, %v499_v7 }
  0x4e   : > { %1430 = vmatprep.subr.bf16.mxu1 %v1676_v0 }
  0x4f   : > { %601 = vmatpush1.bf16.msra.mxu0 %v1336_v35 }
  0x50   : > { %602 = vmatprep.subr.bf16.mxu0 %v1335_v38 }
  0x51   : > { %1431 = vmatpush3.bf16.msra.mxu1 %v1530_v10  ;;  %v677_v10 = vld [vmem:[#allocation5 + $0x68] sm:$0xff] }
  0x52   : > { %1432 = vmatprep.subr.bf16.mxu1 %v1676_v0  ;;  %v1353_v0 = vcombine.high %v680_v61, %v681_v62  ;;  %v1348_v12 = vcombine.low %v676_v8, %v677_v10  ;;  %v1349_v13 = vcombine.high %v676_v8, %v677_v10  ;;  %v1387_v62 = vcombine.high %v1030_v57, %v1031_v58  ;;  %v853_v8 = vld [vmem:[#allocation5 + $0xb0] sm:$0xff]  ;;  %v1027_v10 = vld [vmem:[#allocation5 + $0xb8] sm:$0xff] }
  0x53   : > { %603 = vmatpush1.bf16.msra.mxu0 %v1334_v39  ;;  %v861_v39 = vld [vmem:[#allocation5 + $0x1b0] sm:$0xff] }
  0x54   : > { %604 = vmatprep.subr.bf16.mxu0 %v1333_v9  ;;  %v1026_v9 = vld [vmem:[#allocation5 + $0x98] sm:$0xff] }
  0x55   : > { %1433 = vmatpush3.bf16.msra.mxu1 %v1531_v11  ;;  %v1332_v11 = vcombine.low %v498_v6, %v499_v7  ;;  %v1385_v6 = vcombine.high %v1028_v1, %v1029_v2  ;;  %v852_v7 = vld [vmem:[#allocation5 + $0x90] sm:$0xff]  ;;  %v1383_v14 = vcombine.high %v1026_v9, %v1027_v10 }
  0x56   : > { %770 = vmatprep.subr.bf16.mxu1 %v1361_v21  ;;  %v1347_v21 = vcombine.high %v674_v16, %v675_v18 }
  0x57   : > { %605 = vmatpush1.bf16.msra.mxu0 %v1332_v11 }
  0x58   : > { %606 = vmatprep.subr.bf16.mxu0 %v1331_v17  ;;  %v1024_v17 = vld [vmem:[#allocation5 + $0x58] sm:$0xff] }
  0x5b   : > { %607 = vmatpush1.bf16.msra.mxu0 %v1330_v19  ;;  %v1366_v19 = vcombine.low %v852_v7, %v853_v8 }
  0x5c   : > { %944 = vmatprep.subr.bf16.mxu0 %v1377_v25  ;;  %v1022_v25 = vld [vmem:[#allocation5 + $0x18] sm:$0xff] }
  0xfd   : > { %v366_v41 = vpop.f32.mrf.mxu0 }
  0xfe   : > { %v367_v43 = vadd.f32 %v1318_v40, %v366_v41  ;;  %v1035_v41 = vld [vmem:[#allocation5 + $0x1b8] sm:$0xff] }
  0xff   : > { %v1416_v42 = vpop.f32.mrf.mxu0 }
 0x100   : > { %v373_v49 = vmax.f32 %v367_v43, 0.0 }
 0x101   : > { %v369_v44 = vpop.f32.mrf.mxu0 }
 0x102   : > { %v370_v45 = vadd.f32 %v1318_v40, %v369_v44  ;;  %v1034_v40 = vld [vmem:[#allocation5 + $0x198] sm:$0xff] }
 0x103   : > { %v1417_v46 = vpop.f32.mrf.mxu0 }
 0x104   : > { %v374_v50 = vmax.f32 %v370_v45, 0.0  ;;  %v1375_v45 = vcombine.high %v860_v37, %v861_v39  ;;  %v1391_v46 = vcombine.high %v1034_v40, %v1035_v41 }
 0x106   : > { %v375_v51 = vpack.c.bf16 %v374_v50, %v373_v49  ;;  %v1032_v49 = vld [vmem:[#allocation5 + $0x158] sm:$0xff] }
 0x107   : > { %v1033_v50 = vld [vmem:[#allocation5 + $0x178] sm:$0xff] }
 0x108   : > { %1435 = vmatmul.mubr.bf16.vlgmr.msra.gmra.mxu1 %v375_v51  ;;  %v1374_v51 = vcombine.low %v860_v37, %v861_v39  ;;  %v1389_v54 = vcombine.high %v1032_v49, %v1033_v50 }
 0x109   : > { %771 = vmatpush1.bf16.msra.mxu1 %v1360_v20  ;;  %v1346_v20 = vcombine.low %v674_v16, %v675_v18  ;;  %802 = vmatprep.mubr.bf16.mxu1 %v1678_v30  ;;  %v851_v16 = vld [vmem:[#allocation5 + $0x70] sm:$0xff]  ;;  %v1025_v18 = vld [vmem:[#allocation5 + $0x78] sm:$0xff] }
 0x10a   : > { %772 = vmatprep.subr.bf16.mxu1 %v1359_v52  ;;  %v1390_v52 = vcombine.low %v1034_v40, %v1035_v41  ;;  %v1381_v22 = vcombine.high %v1024_v17, %v1025_v18 }
 0x10d   : > { %773 = vmatpush1.bf16.msra.mxu1 %v1358_v55  ;;  %v856_v55 = vld [vmem:[#allocation5 + $0x110] sm:$0xff] }
 0x10e   : > { %774 = vmatprep.subr.bf16.mxu1 %v1357_v56  ;;  %v857_v56 = vld [vmem:[#allocation5 + $0x130] sm:$0xff] }
 0x10f   : > { %v1371_v61 = vcombine.high %v856_v55, %v857_v56 }
 0x111   : > { %775 = vmatpush1.bf16.msra.mxu1 %v1356_v59  ;;  %v1372_v59 = vcombine.low %v858_v47, %v859_v48 }
 0x112   : > { %776 = vmatprep.subr.bf16.mxu1 %v1355_v60  ;;  %v1388_v60 = vcombine.low %v1032_v49, %v1033_v50 }
 0x115   : > { %777 = vmatpush1.bf16.msra.mxu1 %v1354_v63  ;;  %v854_v63 = vld [vmem:[#allocation5 + $0xd0] sm:$0xff] }
 0x116   : > { %778 = vmatprep.subr.bf16.mxu1 %v1353_v0  ;;  %v855_v0 = vld [vmem:[#allocation5 + $0xf0] sm:$0xff] }
 0x117   : > { %v1368_v11 = vcombine.low %v854_v63, %v855_v0 }
 0x119   : > { %779 = vmatpush1.bf16.msra.mxu1 %v1352_v3  ;;  %v1370_v3 = vcombine.low %v856_v55, %v857_v56 }
 0x11a   : > { %780 = vmatprep.subr.bf16.mxu1 %v1351_v4  ;;  %v1386_v4 = vcombine.low %v1030_v57, %v1031_v58 }
 0x11d   : > { %781 = vmatpush1.bf16.msra.mxu1 %v1350_v5  ;;  %v1369_v5 = vcombine.high %v854_v63, %v855_v0 }
 0x11e   : > { %782 = vmatprep.subr.bf16.mxu1 %v1349_v13  ;;  %v1367_v13 = vcombine.high %v852_v7, %v853_v8 }
 0x121   : > { %783 = vmatpush1.bf16.msra.mxu1 %v1348_v12  ;;  %v1384_v12 = vcombine.low %v1028_v1, %v1029_v2 }
 0x122   : > { %784 = vmatprep.subr.bf16.mxu1 %v1347_v21  ;;  %v1365_v21 = vcombine.high %v850_v15, %v851_v16 }
 0x125   : > { %785 = vmatpush1.bf16.msra.mxu1 %v1346_v20  ;;  %v1382_v20 = vcombine.low %v1026_v9, %v1027_v10 }
 0x126   : > { %1118 = vmatprep.subr.bf16.mxu1 %v1393_v29  ;;  %v1363_v29 = vcombine.high %v848_v23, %v849_v24 }
 0x1c8   : > { %v481_v32 = vpop.f32.mrf.mxu1 }
 0x1c9   : > { %v482_v34 = vadd.f32 %v1321_v31, %v481_v32  ;;  %v1378_v32 = vcombine.low %v1022_v25, %v1023_v26 }
 0x1ca   : > { %v1436_v33 = vpop.f32.mrf.mxu1 }
 0x1cb   : > { %v488_v42 = vmax.f32 %v482_v34, 0.0  ;;  %v1679_v33 = vmov -3.4028235e+38  }
 0x1cc   : > { %v484_v35 = vpop.f32.mrf.mxu1  ;;  %495 = vst [vmem:[%s1839_s18] sm:$0xff] %v1679_v33 }
 0x1cd   : > { %v485_v36 = vadd.f32 %v1321_v31, %v484_v35  ;;  %v1362_v31 = vcombine.low %v848_v23, %v849_v24 }
 0x1ce   : > { %v1437_v38 = vpop.f32.mrf.mxu1 }
 0x1cf   : > { %v489_v43 = vmax.f32 %v485_v36, 0.0 }
 0x1d1   : > { %v1830_v44 = vpack.c.bf16 %v489_v43, %v488_v42 }
 0x1d3   : > { %625 = vmatmul.mubr.bf16.vlgmr.msra.gmra.mxu0 %v1830_v44  ;;  %803 = vmatmul.mubr.bf16.vlgmr.msra.gmra.mxu1 %v1830_v44 }
 0x1d4   : > { %945 = vmatpush1.bf16.msra.mxu0 %v1376_v27  ;;  %1119 = vmatpush1.bf16.msra.mxu1 %v1392_v28  ;;  %v1364_v27 = vcombine.low %v850_v15, %v851_v16  ;;  %v1380_v28 = vcombine.low %v1024_v17, %v1025_v18  ;;  %v649_v16 = vld [vmem:[%s1839_s18] sm:$0x3]  ;;  %v827_v17 = vld [vmem:[%s1839_s18 + $0x2] sm:$0x3] }
 0x1d5   : > { %946 = vmatprep.subr.bf16.mxu0 %v1375_v45  ;;  %1120 = vmatprep.subr.bf16.mxu1 %v1391_v46 }
 0x1d6   : > { %976 = vmatprep.mubr.bf16.mxu0 %v1678_v30  ;;  %1150 = vmatprep.mubr.bf16.mxu1 %v1678_v30  ;;  %v1379_v30 = vcombine.high %v1022_v25, %v1023_v26 }
 0x1d8   : > { %947 = vmatpush1.bf16.msra.mxu0 %v1374_v51  ;;  %1121 = vmatpush1.bf16.msra.mxu1 %v1390_v52  ;;  %v1680_v52 = vmov 1966171168  }
 0x1d9   : > { %948 = vmatprep.subr.bf16.mxu0 %v1373_v53  ;;  %1122 = vmatprep.subr.bf16.mxu1 %v1389_v54  ;;  %v654_v53 = vunpack.c.l.s4 %v1680_v52  ;;  %v656_v54 = vlaneseq }
 0x1db   : > { %v655_v63 = vunpack.c.0.s8 %v654_v53  ;;  %v657_v0 = vshrl.u32 %v656_v54, 7  ;;  %vm1850_vm3 = vcmp.lt.s32.totalorder %v656_v54, 256 }
 0x1dc   : > { %949 = vmatpush1.bf16.msra.mxu0 %v1372_v59  ;;  %1123 = vmatpush1.bf16.msra.mxu1 %v1388_v60 }
 0x1dd   : > { %950 = vmatprep.subr.bf16.mxu0 %v1371_v61  ;;  %1124 = vmatprep.subr.bf16.mxu1 %v1387_v62  ;;  %v1842_v7 = vsub.s32 %v655_v63, %v657_v0  ;;  %v1001_v63 = vld [vmem:[%s1839_s18 + $0x4] sm:$0x3]  ;;  %v1175_v0 = vld [vmem:[%s1839_s18 + $0x6] sm:$0x3] }
 0x1e0   : > { %951 = vmatpush1.bf16.msra.mxu0 %v1370_v3  ;;  %1125 = vmatpush1.bf16.msra.mxu1 %v1386_v4 }
 0x1e1   : > { %952 = vmatprep.subr.bf16.mxu0 %v1369_v5  ;;  %1126 = vmatprep.subr.bf16.mxu1 %v1385_v6 }
 0x1e4   : > { %953 = vmatpush1.bf16.msra.mxu0 %v1368_v11  ;;  %1127 = vmatpush1.bf16.msra.mxu1 %v1384_v12 }
 0x1e5   : > { %954 = vmatprep.subr.bf16.mxu0 %v1367_v13  ;;  %1128 = vmatprep.subr.bf16.mxu1 %v1383_v14 }
 0x1e8   : > { %955 = vmatpush1.bf16.msra.mxu0 %v1366_v19  ;;  %1129 = vmatpush1.bf16.msra.mxu1 %v1382_v20 }
 0x1e9   : > { %956 = vmatprep.subr.bf16.mxu0 %v1365_v21  ;;  %1130 = vmatprep.subr.bf16.mxu1 %v1381_v22 }
 0x1ec   : > { %957 = vmatpush1.bf16.msra.mxu0 %v1364_v27  ;;  %1131 = vmatpush1.bf16.msra.mxu1 %v1380_v28 }
 0x1ed   : > { %958 = vmatprep.subr.bf16.mxu0 %v1363_v29  ;;  %1132 = vmatprep.subr.bf16.mxu1 %v1379_v30 }
 0x1f0   : > { %959 = vmatpush1.bf16.msra.mxu0 %v1362_v31  ;;  %1133 = vmatpush1.bf16.msra.mxu1 %v1378_v32 }
 0x1f3   : > { %977 = vmatmul.mubr.bf16.vlgmr.msra.gmra.mxu0 %v1830_v44  ;;  %1151 = vmatmul.mubr.bf16.vlgmr.msra.gmra.mxu1 %v1830_v44 }
 0x293   : > { %v626_v34 = vpop.f32.mrf.mxu0  ;;  %v804_v35 = vpop.f32.mrf.mxu1 }
 0x295   : > { %v628_v36 = vpop.f32.mrf.mxu0  ;;  %v806_v37 = vpop.f32.mrf.mxu1 }
 0x297   : > { %v630_v38 = vpop.f32.mrf.mxu0  ;;  %v808_v39 = vpop.f32.mrf.mxu1 }
 0x298   : > { %v635_v40 = vmax.f32 %v626_v34, %v630_v38  ;;  %v813_v41 = vmax.f32 %v804_v35, %v808_v39 }
 0x299   : > { %v632_v42 = vpop.f32.mrf.mxu0  ;;  %v810_v43 = vpop.f32.mrf.mxu1 }
 0x29a   : > { %v636_v45 = vrot.slane %v635_v40, 4  ;;  %v814_v44 = vrot.slane %v813_v41, 4  ;;  %v642_v46 = vmax.f32 %v628_v36, %v632_v42  ;;  %v820_v47 = vmax.f32 %v806_v37, %v810_v43 }
 0x29c   : > { %v637_v48 = vmax.f32 %v635_v40, %v636_v45  ;;  %v815_v49 = vmax.f32 %v813_v41, %v814_v44  ;;  %v643_v50 = vrot.slane %v642_v46, 4  ;;  %v821_v51 = vrot.slane %v820_v47, 4 }
 0x29e   : > { %v638_v55 = vrot.slane %v637_v48, 2  ;;  %v816_v56 = vrot.slane %v815_v49, 2  ;;  %v644_v57 = vmax.f32 %v642_v46, %v643_v50  ;;  %v822_v58 = vmax.f32 %v820_v47, %v821_v51 }
 0x2a0   : > { %v639_v59 = vmax.f32 %v637_v48, %v638_v55  ;;  %v817_v60 = vmax.f32 %v815_v49, %v816_v56  ;;  %v645_v61 = vrot.slane %v644_v57, 2  ;;  %v823_v62 = vrot.slane %v822_v58, 2 }
 0x2a2   : > { %v640_v1 = vrot.slane %v639_v59, 1  ;;  %v818_v2 = vrot.slane %v817_v60, 1  ;;  %v646_v3 = vmax.f32 %v644_v57, %v645_v61  ;;  %v824_v4 = vmax.f32 %v822_v58, %v823_v62 }
 0x2a4   : > { %v647_v5 = vrot.slane %v646_v3, 1  ;;  %v825_v6 = vrot.slane %v824_v4, 1  ;;  %v641_v8 = vmax.f32 %v639_v59, %v640_v1  ;;  %v819_v9 = vmax.f32 %v817_v60, %v818_v2 }
 0x2a6   : > { %v648_v10 = vmax.f32 %v646_v3, %v647_v5  ;;  %v826_v11 = vmax.f32 %v824_v4, %v825_v6 }
 0x2a8   : > { %v652_v12 = vcombine.low %v641_v8, %v648_v10  ;;  %v830_v13 = vcombine.low %v819_v9, %v826_v11 }
 0x2aa   : > { %v659_v14 = vrot.slane %v652_v12, %v1842_v7  ;;  %v837_v15 = vrot.slane %v830_v13, %v1842_v7 }
 0x2ac   : > { %v666_v18 = vrot.slane %v659_v14, %v1842_v7  ;;  %v844_v19 = vrot.slane %v837_v15, %v1842_v7 }
 0x2ae   : > { %v668_v21 = vmax.f32 %v649_v16, %v666_v18  ;;  %v846_v22 = vmax.f32 %v827_v17, %v844_v19 }
 0x2b0   : > { %673 = vst.msk [vmem:[%s1839_s18] sm:$0x3] %vm1850_vm3, %v668_v21  ;;  %847 = vst.msk [vmem:[%s1839_s18 + $0x2] sm:$0x3] %vm1850_vm3, %v846_v22 }
 0x2b3   : > { %v978_v23 = vpop.f32.mrf.mxu0  ;;  %v1152_v24 = vpop.f32.mrf.mxu1 }
 0x2b5   : > { %v980_v25 = vpop.f32.mrf.mxu0  ;;  %v1154_v26 = vpop.f32.mrf.mxu1 }
 0x2b7   : > { %v982_v27 = vpop.f32.mrf.mxu0  ;;  %v1156_v28 = vpop.f32.mrf.mxu1 }
 0x2b8   : > { %v987_v29 = vmax.f32 %v978_v23, %v982_v27  ;;  %v1161_v30 = vmax.f32 %v1152_v24, %v1156_v28 }
 0x2b9   : > { %v984_v31 = vpop.f32.mrf.mxu0  ;;  %v1158_v32 = vpop.f32.mrf.mxu1 }
 0x2ba   : > { %v988_v33 = vrot.slane %v987_v29, 4  ;;  %v1162_v34 = vrot.slane %v1161_v30, 4  ;;  %v994_v35 = vmax.f32 %v980_v25, %v984_v31  ;;  %v1168_v36 = vmax.f32 %v1154_v26, %v1158_v32 }
 0x2bc   : > { %v989_v37 = vmax.f32 %v987_v29, %v988_v33  ;;  %v1163_v38 = vmax.f32 %v1161_v30, %v1162_v34  ;;  %v995_v39 = vrot.slane %v994_v35, 4  ;;  %v1169_v40 = vrot.slane %v1168_v36, 4 }
 0x2be   : > { %v990_v41 = vrot.slane %v989_v37, 2  ;;  %v1164_v42 = vrot.slane %v1163_v38, 2  ;;  %v996_v43 = vmax.f32 %v994_v35, %v995_v39  ;;  %v1170_v45 = vmax.f32 %v1168_v36, %v1169_v40 }
 0x2c0   : > { %v991_v44 = vmax.f32 %v989_v37, %v990_v41  ;;  %v1165_v46 = vmax.f32 %v1163_v38, %v1164_v42  ;;  %v997_v47 = vrot.slane %v996_v43, 2  ;;  %v1171_v48 = vrot.slane %v1170_v45, 2 }
 0x2c2   : > { %v992_v49 = vrot.slane %v991_v44, 1  ;;  %v1166_v50 = vrot.slane %v1165_v46, 1  ;;  %v998_v51 = vmax.f32 %v996_v43, %v997_v47  ;;  %v1172_v52 = vmax.f32 %v1170_v45, %v1171_v48 }
 0x2c4   : > { %v999_v53 = vrot.slane %v998_v51, 1  ;;  %v1173_v54 = vrot.slane %v1172_v52, 1  ;;  %v993_v55 = vmax.f32 %v991_v44, %v992_v49  ;;  %v1167_v56 = vmax.f32 %v1165_v46, %v1166_v50 }
 0x2c6   : > { %v1000_v57 = vmax.f32 %v998_v51, %v999_v53  ;;  %v1174_v58 = vmax.f32 %v1172_v52, %v1173_v54 }
 0x2c8   : > { %v1004_v59 = vcombine.low %v993_v55, %v1000_v57  ;;  %v1178_v60 = vcombine.low %v1167_v56, %v1174_v58 }
 0x2ca   : > { %v1011_v61 = vrot.slane %v1004_v59, %v1842_v7  ;;  %v1185_v62 = vrot.slane %v1178_v60, %v1842_v7 }
 0x2cc   : > { %v1018_v1 = vrot.slane %v1011_v61, %v1842_v7  ;;  %v1192_v2 = vrot.slane %v1185_v62, %v1842_v7 }
 0x2ce   : > { %v1020_v3 = vmax.f32 %v1001_v63, %v1018_v1  ;;  %v1194_v4 = vmax.f32 %v1175_v0, %v1192_v2 }
 0x2d0   : > { %1021 = vst.msk [vmem:[%s1839_s18 + $0x4] sm:$0x3] %vm1850_vm3, %v1020_v3  ;;  %1195 = vst.msk [vmem:[%s1839_s18 + $0x6] sm:$0x3] %vm1850_vm3, %v1194_v4 }
 0x2d1   : > { %1597 = shalt.err (!%p1594_p9)
}
 0x2d2   : > { %s1598_s30 = scalar_lea.hbm %s1871_s19, 128  ;;  %s1602_s16 = scalar_lea.hbm %s1925_s6, 256 }
 0x2d3   : > { %p1599_p12 = scmp.ne.s32.totalorder %s1871_s19, %s1598_s30  ;;  %p1603_p5 = scmp.lt.s32.totalorder %s1871_s19, %s1925_s6 }
 0x2d4   : > { %p1604_p3 = scmp.lt.s32.totalorder %s1602_s16, %s1598_s30 }
 0x2d5   : > { %p1600_p1 = pnand %p1599_p12, %p1934_p10 }
 0x2d6   : > { %p1605_p4 = por %p1604_p3, %p1603_p5 }
 0x2d7   : > { %p1601_p2 = pneg %p1600_p1 }
 0x2d9   : > { %p1606_p8 = pnand %p1605_p4, %p1601_p2 }
 0x2db   : > { %1609 = shalt.err (!%p1606_p8)
}
 0x2dc   : > { %1446 = dma.vmem_to_hbm [thread:$0]  (%p1934_p10), %s1212_s14, 128, %s1871_s19, %s1197_s24  }
 0x2dd PF: > { %p1463_p11 = scmp.ge.s32.totalorder %s1668_s26, 2  ;;  %s1223_s15 = sand.u32 1, %s1648_s21  }
 0x2de   : > { %p1935_p13 = scmp.ne.s32.totalorder %s1928_s9, 0  ;;  %s1224_s17 = scalar_lea.sflag [#allocation4], %s1223_s15 }
 0x2e0   : > { %p1456_p0 = pnand %p1463_p11, %p1935_p13 }
 0x2e2   : > { %p1457_p6 = pneg %p1456_p0 }
 0x2e4   : > { %1643 = dma.done.wait (%p1457_p6), %s1224_s17, 128  }
 0x2e5   : > { %1645 = vsyncadd (%p1457_p6), %s1224_s17, 4294967168  ;;  %s21_s26 = sadd.s32 1, %s1668_s26   ;;  %s1936_s21 = smov %s1652_s22 }
 0x2e6   : > { %p18_p7 = scmp.ge.s32.totalorder %s21_s26, 4   ;;  %s1937_s22 = smov %s1656_s23 }
 0x2e7   : > { %s1938_s23 = smov %s1770_s10  ;;  %s1939_s24 = smov %s1664_s25 }
 0x2e8   : > { %s1940_s25 = smov %s1942_s29  ;;  %20 = sbr.rel (!%p18_p7) target bundleno = 6 (0x6), region = 92 }
 0x2ed   :  { %1229 = vsyncpa [#allocation3], 1 }
 0x2ee   :  { %1231 = vsyncpa [#allocation3 + $0x1], 1 }
 0x2ef   :  { %1232 = vsyncpa [#allocation6], 1 }
 0x2f0   :  { %1233 = vsyncpa [#allocation4], 1 }
 0x2f1   :  { %1235 = vsyncpa [#allocation4 + $0x1], 1 }

</bundles_post_ra>
